<compile_context>
chip_gen: v7x
topology: tpu7x:2x2x1
jax: 0.10.0
libtpu: 0.0.40
codegen_flags: <defaults>
</compile_context>

<pallas_src>
import math

import jax
import jax.numpy as jnp
from jax.experimental import pallas as pl
from jax.experimental.pallas import tpu as pltpu


# --------------------------------------------------------------------------
# In-kernel helper: 3x3 conv (pad=1) + folded BN + ReLU as three per-row-tap
# matmuls on row-shifted views (zero rows at per-image H borders = padding).
# --------------------------------------------------------------------------
def _conv3x3_bn_relu(a, band_ref, bias_ref):
    # a:        (Nb, H, Lin)   bf16
    # band_ref: (3, Lin, Lout) bf16  (tap 0: input row h-1, tap 1: h, tap 2: h+1)
    # bias_ref: (1, Lout)      f32   folded-BN bias (scale already in band cols)
    nb, h, lin = a.shape
    lout = band_ref.shape[2]
    zero_row = jnp.zeros((nb, 1, lin), a.dtype)
    above = jnp.concatenate([zero_row, a[:, :-1, :]], axis=1)   # input row h-1
    below = jnp.concatenate([a[:, 1:, :], zero_row], axis=1)    # input row h+1
    acc = jnp.dot(above.reshape(nb * h, lin), band_ref[0],
                  preferred_element_type=jnp.float32)
    acc += jnp.dot(a.reshape(nb * h, lin), band_ref[1],
                   preferred_element_type=jnp.float32)
    acc += jnp.dot(below.reshape(nb * h, lin), band_ref[2],
                   preferred_element_type=jnp.float32)
    y = jnp.maximum(acc + bias_ref[...], 0.0)                   # f32 epilogue
    return y.reshape(nb, h, lout).astype(jnp.bfloat16)


# --------------------------------------------------------------------------
# Fused Pallas kernel: upsample + concat + conv1+BN+ReLU + conv2+BN+ReLU
# --------------------------------------------------------------------------
def _decoder_block_kernel(x_ref, skip_ref, uhb_ref, kw_ref,
                          b1_ref, bias1_ref, b2_ref, bias2_ref, out_ref):
    # x_ref:    (Nb, Hs, Ws*Cx)     bf16  pre-upsample input
    # skip_ref: (Nb, H,  W*Cs)      bf16  skip connection (H=2*Hs, W=2*Ws)
    # uhb_ref:  (Nb*H, Nb*Hs)       bf16  block-diag bilinear x2 row-interp
    # kw_ref:   (Ws*Cx, W*Cx)       bf16  bilinear x2 col-interp (kron I_Cx)
    # b1_ref:   (3, W*Cin1, W*Cout) bf16  conv1 row-tap bands (BN scale folded)
    # b2_ref:   (3, W*Cout, W*Cout) bf16  conv2 row-tap bands (BN scale folded)
    # bias*:    (1, W*Cout)         f32   folded-BN bias
    # out_ref:  (Nb, H, W*Cout)     bf16  lane-dense output slab
    f32, bf16 = jnp.float32, jnp.bfloat16
    nb, hs, lx = x_ref.shape
    h = skip_ref.shape[1]

    # ---- bilinear x2 upsample: two fixed-weight MXU matmuls, M = Nb*H ----
    x_flat = x_ref[...].reshape(nb * hs, lx)
    uh_x = jnp.dot(uhb_ref[...], x_flat, preferred_element_type=f32)   # (Nb*H, Ws*Cx)
    u = jnp.dot(uh_x.astype(bf16), kw_ref[...],
                preferred_element_type=f32).astype(bf16)               # (Nb*H, W*Cx)

    # ---- channel concat [upsampled x, skip], entirely in bf16 ----
    cat = jnp.concatenate([u.reshape(nb, h, -1), skip_ref[...]], axis=2)

    # ---- conv1 / conv2: per-row-tap matmuls, f32 acc, bias + ReLU ----
    y1 = _conv3x3_bn_relu(cat, b1_ref, bias1_ref)                      # (Nb,H,W*Cout)
    y2 = _conv3x3_bn_relu(y1, b2_ref, bias2_ref)
    out_ref[...] = y2                                                  # bf16 store


# --------------------------------------------------------------------------
# Wrapper-side precomputation (traced once; plain XLA)
# --------------------------------------------------------------------------
def _bilinear_x2_matrix(size):
    """(2*size, size) matrix of torch.nn.Upsample(scale=2, bilinear, ac=False)."""
    out = jnp.arange(2 * size, dtype=jnp.float32)
    src = jnp.clip((out + 0.5) / 2.0 - 0.5, 0.0, float(size - 1))
    i0 = jnp.floor(src).astype(jnp.int32)
    i1 = jnp.minimum(i0 + 1, size - 1)
    frac = src - i0.astype(jnp.float32)
    eye = jnp.eye(size, dtype=jnp.float32)
    return eye[i0] * (1.0 - frac)[:, None] + eye[i1] * frac[:, None]


def _band_matrices(w_hwio, W):
    """(3,3,Cin,Cout) conv weights -> (3, W*Cin, W*Cout) banded matrices.

    B[dy] maps the row-flattened input row h+dy-1 (lane index w'*Cin+ci) to the
    row-flattened output row h (lane index w*Cout+co); the band structure
    implements the 3 taps along W including the zero padding at the W borders.
    """
    mats = []
    for dy in range(3):
        b = 0.0
        for dx in range(3):
            sel = jnp.eye(W, W, k=1 - dx, dtype=jnp.float32)  # [w',w]=1 iff w'=w+dx-1
            b = b + jnp.kron(sel, w_hwio[dy, dx].astype(jnp.float32))
        mats.append(b)
    return jnp.stack(mats)                                     # (3, W*Cin, W*Cout)


def _pick_batch_block(n, h, target_rows=256):
    """Largest divisor of n with nb*h <= target_rows (raise matmul M)."""
    nb = max(1, min(n, max(1, target_rows // max(h, 1))))
    while n % nb:
        nb -= 1
    return nb


def decoder_block_forward(x_nchw, skip_nchw, params):
    """Forward of DecoderBlock.  Inputs NCHW to mirror the PyTorch module;
    output is NCHW bf16 (downstream decoder stages consume bf16)."""
    N, Cx, Hs, Ws = x_nchw.shape
    _, Cs, H, W = skip_nchw.shape
    w1, w2 = params["w1"], params["w2"]                         # HWIO
    Cout = w1.shape[-1]
    cin1 = Cx + Cs
    bf16, f32 = jnp.bfloat16, jnp.float32

    nb = _pick_batch_block(N, H)
    grid = (N // nb,)

    # NCHW -> NHWC, flatten (W, C) into the lane dim, activations in bf16.
    x_rows = jnp.transpose(x_nchw, (0, 2, 3, 1)).reshape(N, Hs, Ws * Cx).astype(bf16)
    skip_rows = jnp.transpose(skip_nchw, (0, 2, 3, 1)).reshape(N, H, W * Cs).astype(bf16)

    # Fixed bilinear-x2 interpolation matrices.  The row-interp matrix is made
    # block-diagonal over the Nb images folded into a grid step so the row
    # upsample is ONE matmul with M = Nb*H.
    uh = _bilinear_x2_matrix(Hs)                                            # (H, Hs)
    uhb = jnp.kron(jnp.eye(nb, dtype=f32), uh).astype(bf16)                 # (nb*H, nb*Hs)
    kw = jnp.kron(_bilinear_x2_matrix(Ws).T,
                  jnp.eye(Cx, dtype=f32)).astype(bf16)                      # (Ws*Cx, W*Cx)

    # Banded conv weights kept as 3 separate row-tap bands (per-dy matmuls).
    # conv1's input-channel concat is folded in by stacking x/skip row blocks;
    # the folded-BN scale is folded into the band columns.
    scale1_lane = jnp.tile(params["scale1"].astype(f32), W)                 # (W*Cout,)
    scale2_lane = jnp.tile(params["scale2"].astype(f32), W)
    b1 = jnp.concatenate([_band_matrices(w1[:, :, :Cx, :], W),
                          _band_matrices(w1[:, :, Cx:, :], W)], axis=1)
    b1 = (b1 * scale1_lane[None, None, :]).astype(bf16)                     # (3, W*cin1, W*Cout)
    b2 = (_band_matrices(w2, W) * scale2_lane[None, None, :]).astype(bf16)  # (3, W*Cout, W*Cout)
    o1 = jnp.tile(params["bias1"].astype(f32), W).reshape(1, W * Cout)
    o2 = jnp.tile(params["bias2"].astype(f32), W).reshape(1, W * Cout)

    def _inv(shape):
        # Grid-invariant operand: single-buffered (saves VMEM, esp. v7x 64 MiB).
        return pl.BlockSpec(shape, lambda g: (0,) * len(shape),
                            pipeline_mode=pl.Buffered(1))

    # VMEM budget from actual buffer sizes: never below the 32 MiB default,
    # never claims v7x's entire 64 MiB.
    def _bytes(shape, itemsize):
        return math.prod(shape) * itemsize
    need = (2 * (_bytes((nb, Hs, Ws * Cx), 2) + _bytes((nb, H, W * Cs), 2)
                 + _bytes((nb, H, W * Cout), 2))                 # double-buffered blocks
            + _bytes(uhb.shape, 2) + _bytes(kw.shape, 2)
            + _bytes(b1.shape, 2) + _bytes(b2.shape, 2)
            + 2 * _bytes((1, W * Cout), 4)                       # single-buffered invariants
            + 8 * _bytes((nb * H, W * cin1), 4))                 # intermediate slab headroom
    vmem_limit = int(min(48 * 2**20, max(32 * 2**20, 2 * need)))

    out_rows = pl.pallas_call(
        _decoder_block_kernel,
        out_shape=jax.ShapeDtypeStruct((N, H, W * Cout), bf16),
        grid=grid,
        in_specs=[
            pl.BlockSpec((nb, Hs, Ws * Cx), lambda g: (g, 0, 0)),
            pl.BlockSpec((nb, H, W * Cs), lambda g: (g, 0, 0)),
            _inv((nb * H, nb * Hs)),
            _inv((Ws * Cx, W * Cx)),
            _inv((3, W * cin1, W * Cout)),
            _inv((1, W * Cout)),
            _inv((3, W * Cout, W * Cout)),
            _inv((1, W * Cout)),
        ],
        out_specs=pl.BlockSpec((nb, H, W * Cout), lambda g: (g, 0, 0)),
        compiler_params=pltpu.CompilerParams(
            dimension_semantics=("parallel",),
            vmem_limit_bytes=vmem_limit),
    )(x_rows, skip_rows, uhb, kw, b1, o1, b2, o2)

    out = out_rows.reshape(N, H, W, Cout)
    return jnp.transpose(out, (0, 3, 1, 2))              # -> NCHW (bf16)


def fold_bn(gamma, beta, mean, var, eps=1e-5):
    scale = gamma / jnp.sqrt(var + eps)
    return scale, beta - mean * scale


# --------------------------------------------------------------------------
# Pure-JAX f32 reference (for a correctness self-check)
# --------------------------------------------------------------------------
def _reference_forward(x_nchw, skip_nchw, params):
    def up_axis(a, axis):
        size = a.shape[axis]
        out = jnp.arange(2 * size, dtype=jnp.float32)
        src = jnp.maximum((out + 0.5) / 2.0 - 0.5, 0.0)
        i0 = jnp.floor(src).astype(jnp.int32)
        i1 = jnp.minimum(i0 + 1, size - 1)
        frac = src - i0.astype(jnp.float32)
        bshape = [1] * a.ndim
        bshape[axis] = 2 * size
        frac = frac.reshape(bshape)
        return jnp.take(a, i0, axis=axis) * (1.0 - frac) + jnp.take(a, i1, axis=axis) * frac

    def conv_bn_relu(a, w, s, b):
        y = jax.lax.conv_general_dilated(
            a, w, (1, 1), "SAME", dimension_numbers=("NHWC", "HWIO", "NHWC"))
        return jnp.maximum(y * s + b, 0.0)

    x = jnp.transpose(x_nchw, (0, 2, 3, 1))
    skip = jnp.transpose(skip_nchw, (0, 2, 3, 1))
    h = jnp.concatenate([up_axis(up_axis(x, 1), 2), skip], axis=-1)
    h = conv_bn_relu(h, params["w1"], params["scale1"], params["bias1"])
    h = conv_bn_relu(h, params["w2"], params["scale2"], params["bias2"])
    return jnp.transpose(h, (0, 3, 1, 2))


if __name__ == "__main__":
    # in_channels=4, skip_channels=4, out_channels=8; x 8x8 -> upsampled 16x16.
    in_channels, skip_channels, out_channels = 4, 4, 8
    N, Hs, Ws = 2, 8, 8
    key = jax.random.PRNGKey(0)
    k_x, k_skip, k_w1, k_w2 = jax.random.split(key, 4)

    x = jax.random.normal(k_x, (N, in_channels, Hs, Ws), dtype=jnp.float32)
    skip = jax.random.normal(k_skip, (N, skip_channels, 2 * Hs, 2 * Ws), jnp.float32)

    cin1 = in_channels + skip_channels
    # PyTorch conv weights are (Cout, Cin, 3, 3); convert to HWIO (3,3,Cin,Cout).
    w1_oihw = 0.1 * jax.random.normal(k_w1, (out_channels, cin1, 3, 3), jnp.float32)
    w2_oihw = 0.1 * jax.random.normal(k_w2, (out_channels, out_channels, 3, 3), jnp.float32)
    w1 = jnp.transpose(w1_oihw, (2, 3, 1, 0))
    w2 = jnp.transpose(w2_oihw, (2, 3, 1, 0))

    c = jnp.arange(out_channels, dtype=jnp.float32)
    scale1, bias1 = fold_bn(1.0 + 0.1 * c, 0.05 * c, 0.02 * c, 1.0 + 0.03 * c)
    scale2, bias2 = fold_bn(1.0 - 0.05 * c, -0.04 * c, -0.01 * c, 1.0 + 0.02 * c)

    params = dict(w1=w1, scale1=scale1, bias1=bias1,
                  w2=w2, scale2=scale2, bias2=bias2)

    fwd = jax.jit(decoder_block_forward)
    out = jax.block_until_ready(fwd(x, skip, params))
    assert out.shape == (N, out_channels, 2 * Hs, 2 * Ws)
    assert out.dtype == jnp.bfloat16
    out_f32 = out.astype(jnp.float32)
    assert bool(jnp.all(jnp.isfinite(out_f32)))

    ref = jax.block_until_ready(_reference_forward(x, skip, params))
    max_err = float(jnp.max(jnp.abs(out_f32 - ref)))
    # bf16 activations / interp matrices / scale-folded weights / bf16 output
    # give ~2^-8-level relative error vs the f32 reference.
    assert max_err < 1e-1, f"max abs error vs reference: {max_err}"

    print("KERNEL_OK")
</pallas_src>

<mosaic_0001>
module attributes {stable_mosaic.version = 11 : i64} {
  func.func @_decoder_block_kernel(%arg0: i32, %arg1: memref<2x8x32xbf16, #tpu.memory_space<vmem>>, %arg2: memref<2x16x64xbf16, #tpu.memory_space<vmem>>, %arg3: memref<32x16xbf16, #tpu.memory_space<vmem>>, %arg4: memref<32x64xbf16, #tpu.memory_space<vmem>>, %arg5: memref<3x128x128xbf16, #tpu.memory_space<vmem>>, %arg6: memref<1x128xf32, #tpu.memory_space<vmem>>, %arg7: memref<3x128x128xbf16, #tpu.memory_space<vmem>>, %arg8: memref<1x128xf32, #tpu.memory_space<vmem>>, %arg9: memref<2x16x128xbf16, #tpu.memory_space<vmem>>) attributes {dimension_semantics = [#tpu.dimension_semantics<parallel>], iteration_bounds = array<i64: 1>, scalar_prefetch = 0 : i64, scratch_operands = 0 : i64, tpu.core_type = #tpu.core_type<tc>, window_params = [{transform_indices = @transform_0, window_bounds = array<i64: 2, 8, 32>}, {transform_indices = @transform_1, window_bounds = array<i64: 2, 16, 64>}, {pipeline_mode = #tpu.pipeline_mode<synchronous>, transform_indices = @transform_2, window_bounds = array<i64: 32, 16>}, {pipeline_mode = #tpu.pipeline_mode<synchronous>, transform_indices = @transform_3, window_bounds = array<i64: 32, 64>}, {pipeline_mode = #tpu.pipeline_mode<synchronous>, transform_indices = @transform_4, window_bounds = array<i64: 3, 128, 128>}, {pipeline_mode = #tpu.pipeline_mode<synchronous>, transform_indices = @transform_5, window_bounds = array<i64: 1, 128>}, {pipeline_mode = #tpu.pipeline_mode<synchronous>, transform_indices = @transform_6, window_bounds = array<i64: 3, 128, 128>}, {pipeline_mode = #tpu.pipeline_mode<synchronous>, transform_indices = @transform_7, window_bounds = array<i64: 1, 128>}, {transform_indices = @transform_8, window_bounds = array<i64: 2, 16, 128>}]} {
    %c0 = arith.constant 0 : index
    %c0_0 = arith.constant 0 : index
    %c0_1 = arith.constant 0 : index
    %0 = vector.load %arg1[%c0, %c0_0, %c0_1] : memref<2x8x32xbf16, #tpu.memory_space<vmem>>, vector<2x8x32xbf16>
    %1 = vector.shape_cast %0 : vector<2x8x32xbf16> to vector<16x32xbf16>
    %c0_2 = arith.constant 0 : index
    %c0_3 = arith.constant 0 : index
    %2 = vector.load %arg3[%c0_2, %c0_3] : memref<32x16xbf16, #tpu.memory_space<vmem>>, vector<32x16xbf16>
    %cst = arith.constant dense<0.000000e+00> : vector<32x32xf32>
    %3 = tpu.matmul %2, %1, %cst {dimension_numbers = #tpu.dot_dimension_numbers<[1], [0], [0], [1], [0, 0, 1, 1], [], []>} : vector<32x16xbf16>, vector<16x32xbf16>, vector<32x32xf32> -> vector<32x32xf32>
    %4 = arith.truncf %3 : vector<32x32xf32> to vector<32x32xbf16>
    %c0_4 = arith.constant 0 : index
    %c0_5 = arith.constant 0 : index
    %5 = vector.load %arg4[%c0_4, %c0_5] : memref<32x64xbf16, #tpu.memory_space<vmem>>, vector<32x64xbf16>
    %cst_6 = arith.constant dense<0.000000e+00> : vector<32x64xf32>
    %6 = tpu.matmul %4, %5, %cst_6 {dimension_numbers = #tpu.dot_dimension_numbers<[1], [0], [0], [1], [0, 0, 1, 1], [], []>} : vector<32x32xbf16>, vector<32x64xbf16>, vector<32x64xf32> -> vector<32x64xf32>
    %7 = arith.truncf %6 : vector<32x64xf32> to vector<32x64xbf16>
    %8 = vector.shape_cast %7 : vector<32x64xbf16> to vector<2x16x64xbf16>
    %c0_7 = arith.constant 0 : index
    %c0_8 = arith.constant 0 : index
    %c0_9 = arith.constant 0 : index
    %9 = vector.load %arg2[%c0_7, %c0_8, %c0_9] : memref<2x16x64xbf16, #tpu.memory_space<vmem>>, vector<2x16x64xbf16>
    %10 = tpu.concatenate %8, %9 in 2 : vector<2x16x64xbf16>, vector<2x16x64xbf16> -> vector<2x16x128xbf16>
    %cst_10 = arith.constant 0.000000e+00 : bf16
    %11 = vector.broadcast %cst_10 : bf16 to vector<2x1x128xbf16>
    %12 = vector.extract_strided_slice %10 {offsets = [0, 0, 0], sizes = [2, 15, 128], strides = [1, 1, 1]} : vector<2x16x128xbf16> to vector<2x15x128xbf16>
    %13 = tpu.concatenate %11, %12 in 1 : vector<2x1x128xbf16>, vector<2x15x128xbf16> -> vector<2x16x128xbf16>
    %14 = vector.extract_strided_slice %10 {offsets = [0, 1, 0], sizes = [2, 15, 128], strides = [1, 1, 1]} : vector<2x16x128xbf16> to vector<2x15x128xbf16>
    %15 = tpu.concatenate %14, %11 in 1 : vector<2x15x128xbf16>, vector<2x1x128xbf16> -> vector<2x16x128xbf16>
    %16 = vector.shape_cast %13 : vector<2x16x128xbf16> to vector<32x128xbf16>
    %c0_11 = arith.constant 0 : index
    %c0_12 = arith.constant 0 : index
    %c0_13 = arith.constant 0 : index
    %17 = vector.load %arg5[%c0_11, %c0_12, %c0_13] : memref<3x128x128xbf16, #tpu.memory_space<vmem>>, vector<1x128x128xbf16>
    %18 = vector.shape_cast %17 : vector<1x128x128xbf16> to vector<128x128xbf16>
    %cst_14 = arith.constant dense<0.000000e+00> : vector<32x128xf32>
    %19 = tpu.matmul %16, %18, %cst_14 {dimension_numbers = #tpu.dot_dimension_numbers<[1], [0], [0], [1], [0, 0, 1, 1], [], []>} : vector<32x128xbf16>, vector<128x128xbf16>, vector<32x128xf32> -> vector<32x128xf32>
    %20 = vector.shape_cast %10 : vector<2x16x128xbf16> to vector<32x128xbf16>
    %c1 = arith.constant 1 : index
    %c0_15 = arith.constant 0 : index
    %c0_16 = arith.constant 0 : index
    %21 = vector.load %arg5[%c1, %c0_15, %c0_16] : memref<3x128x128xbf16, #tpu.memory_space<vmem>>, vector<1x128x128xbf16>
    %22 = vector.shape_cast %21 : vector<1x128x128xbf16> to vector<128x128xbf16>
    %cst_17 = arith.constant dense<0.000000e+00> : vector<32x128xf32>
    %23 = tpu.matmul %20, %22, %cst_17 {dimension_numbers = #tpu.dot_dimension_numbers<[1], [0], [0], [1], [0, 0, 1, 1], [], []>} : vector<32x128xbf16>, vector<128x128xbf16>, vector<32x128xf32> -> vector<32x128xf32>
    %24 = arith.addf %19, %23 : vector<32x128xf32>
    %25 = vector.shape_cast %15 : vector<2x16x128xbf16> to vector<32x128xbf16>
    %c2 = arith.constant 2 : index
    %c0_18 = arith.constant 0 : index
    %c0_19 = arith.constant 0 : index
    %26 = vector.load %arg5[%c2, %c0_18, %c0_19] : memref<3x128x128xbf16, #tpu.memory_space<vmem>>, vector<1x128x128xbf16>
    %27 = vector.shape_cast %26 : vector<1x128x128xbf16> to vector<128x128xbf16>
    %cst_20 = arith.constant dense<0.000000e+00> : vector<32x128xf32>
    %28 = tpu.matmul %25, %27, %cst_20 {dimension_numbers = #tpu.dot_dimension_numbers<[1], [0], [0], [1], [0, 0, 1, 1], [], []>} : vector<32x128xbf16>, vector<128x128xbf16>, vector<32x128xf32> -> vector<32x128xf32>
    %29 = arith.addf %24, %28 : vector<32x128xf32>
    %c0_21 = arith.constant 0 : index
    %c0_22 = arith.constant 0 : index
    %30 = vector.load %arg6[%c0_21, %c0_22] : memref<1x128xf32, #tpu.memory_space<vmem>>, vector<1x128xf32>
    %31 = vector.broadcast %30 : vector<1x128xf32> to vector<32x128xf32>
    %32 = arith.addf %29, %31 : vector<32x128xf32>
    %cst_23 = arith.constant 0.000000e+00 : f32
    %33 = vector.broadcast %cst_23 : f32 to vector<32x128xf32>
    %34 = arith.maximumf %32, %33 : vector<32x128xf32>
    %35 = vector.shape_cast %34 : vector<32x128xf32> to vector<2x16x128xf32>
    %36 = arith.truncf %35 : vector<2x16x128xf32> to vector<2x16x128xbf16>
    %cst_24 = arith.constant 0.000000e+00 : bf16
    %37 = vector.broadcast %cst_24 : bf16 to vector<2x1x128xbf16>
    %38 = vector.extract_strided_slice %36 {offsets = [0, 0, 0], sizes = [2, 15, 128], strides = [1, 1, 1]} : vector<2x16x128xbf16> to vector<2x15x128xbf16>
    %39 = tpu.concatenate %37, %38 in 1 : vector<2x1x128xbf16>, vector<2x15x128xbf16> -> vector<2x16x128xbf16>
    %40 = vector.extract_strided_slice %36 {offsets = [0, 1, 0], sizes = [2, 15, 128], strides = [1, 1, 1]} : vector<2x16x128xbf16> to vector<2x15x128xbf16>
    %41 = tpu.concatenate %40, %37 in 1 : vector<2x15x128xbf16>, vector<2x1x128xbf16> -> vector<2x16x128xbf16>
    %42 = vector.shape_cast %39 : vector<2x16x128xbf16> to vector<32x128xbf16>
    %c0_25 = arith.constant 0 : index
    %c0_26 = arith.constant 0 : index
    %c0_27 = arith.constant 0 : index
    %43 = vector.load %arg7[%c0_25, %c0_26, %c0_27] : memref<3x128x128xbf16, #tpu.memory_space<vmem>>, vector<1x128x128xbf16>
    %44 = vector.shape_cast %43 : vector<1x128x128xbf16> to vector<128x128xbf16>
    %cst_28 = arith.constant dense<0.000000e+00> : vector<32x128xf32>
    %45 = tpu.matmul %42, %44, %cst_28 {dimension_numbers = #tpu.dot_dimension_numbers<[1], [0], [0], [1], [0, 0, 1, 1], [], []>} : vector<32x128xbf16>, vector<128x128xbf16>, vector<32x128xf32> -> vector<32x128xf32>
    %46 = vector.shape_cast %36 : vector<2x16x128xbf16> to vector<32x128xbf16>
    %c1_29 = arith.constant 1 : index
    %c0_30 = arith.constant 0 : index
    %c0_31 = arith.constant 0 : index
    %47 = vector.load %arg7[%c1_29, %c0_30, %c0_31] : memref<3x128x128xbf16, #tpu.memory_space<vmem>>, vector<1x128x128xbf16>
    %48 = vector.shape_cast %47 : vector<1x128x128xbf16> to vector<128x128xbf16>
    %cst_32 = arith.constant dense<0.000000e+00> : vector<32x128xf32>
    %49 = tpu.matmul %46, %48, %cst_32 {dimension_numbers = #tpu.dot_dimension_numbers<[1], [0], [0], [1], [0, 0, 1, 1], [], []>} : vector<32x128xbf16>, vector<128x128xbf16>, vector<32x128xf32> -> vector<32x128xf32>
    %50 = arith.addf %45, %49 : vector<32x128xf32>
    %51 = vector.shape_cast %41 : vector<2x16x128xbf16> to vector<32x128xbf16>
    %c2_33 = arith.constant 2 : index
    %c0_34 = arith.constant 0 : index
    %c0_35 = arith.constant 0 : index
    %52 = vector.load %arg7[%c2_33, %c0_34, %c0_35] : memref<3x128x128xbf16, #tpu.memory_space<vmem>>, vector<1x128x128xbf16>
    %53 = vector.shape_cast %52 : vector<1x128x128xbf16> to vector<128x128xbf16>
    %cst_36 = arith.constant dense<0.000000e+00> : vector<32x128xf32>
    %54 = tpu.matmul %51, %53, %cst_36 {dimension_numbers = #tpu.dot_dimension_numbers<[1], [0], [0], [1], [0, 0, 1, 1], [], []>} : vector<32x128xbf16>, vector<128x128xbf16>, vector<32x128xf32> -> vector<32x128xf32>
    %55 = arith.addf %50, %54 : vector<32x128xf32>
    %c0_37 = arith.constant 0 : index
    %c0_38 = arith.constant 0 : index
    %56 = vector.load %arg8[%c0_37, %c0_38] : memref<1x128xf32, #tpu.memory_space<vmem>>, vector<1x128xf32>
    %57 = vector.broadcast %56 : vector<1x128xf32> to vector<32x128xf32>
    %58 = arith.addf %55, %57 : vector<32x128xf32>
    %cst_39 = arith.constant 0.000000e+00 : f32
    %59 = vector.broadcast %cst_39 : f32 to vector<32x128xf32>
    %60 = arith.maximumf %58, %59 : vector<32x128xf32>
    %61 = vector.shape_cast %60 : vector<32x128xf32> to vector<2x16x128xf32>
    %62 = arith.truncf %61 : vector<2x16x128xf32> to vector<2x16x128xbf16>
    %c0_40 = arith.constant 0 : index
    %c0_41 = arith.constant 0 : index
    %c0_42 = arith.constant 0 : index
    %63 = vector.load %arg9[%c0_40, %c0_41, %c0_42] : memref<2x16x128xbf16, #tpu.memory_space<vmem>>, vector<2x16x128xbf16>
    tpu.vector_store %arg9[%c0_40, %c0_41, %c0_42], %62 {strides = array<i32>} : memref<2x16x128xbf16, #tpu.memory_space<vmem>>, vector<2x16x128xbf16>,
    return
  }
  func.func @transform_0(%arg0: i32) -> (i32, i32, i32) {
    %c0_i32 = arith.constant 0 : i32
    %c0_i32_0 = arith.constant 0 : i32
    %c0_i32_1 = arith.constant 0 : i32
    return %arg0, %c0_i32, %c0_i32_0 : i32, i32, i32
  }
  func.func @transform_1(%arg0: i32) -> (i32, i32, i32) {
    %c0_i32 = arith.constant 0 : i32
    %c0_i32_0 = arith.constant 0 : i32
    %c0_i32_1 = arith.constant 0 : i32
    return %arg0, %c0_i32, %c0_i32_0 : i32, i32, i32
  }
  func.func @transform_2(%arg0: i32) -> (i32, i32) {
    %c0_i32 = arith.constant 0 : i32
    %c0_i32_0 = arith.constant 0 : i32
    %c0_i32_1 = arith.constant 0 : i32
    return %c0_i32, %c0_i32_0 : i32, i32
  }
  func.func @transform_3(%arg0: i32) -> (i32, i32) {
    %c0_i32 = arith.constant 0 : i32
    %c0_i32_0 = arith.constant 0 : i32
    %c0_i32_1 = arith.constant 0 : i32
    return %c0_i32, %c0_i32_0 : i32, i32
  }
  func.func @transform_4(%arg0: i32) -> (i32, i32, i32) {
    %c0_i32 = arith.constant 0 : i32
    %c0_i32_0 = arith.constant 0 : i32
    %c0_i32_1 = arith.constant 0 : i32
    %c0_i32_2 = arith.constant 0 : i32
    return %c0_i32, %c0_i32_0, %c0_i32_1 : i32, i32, i32
  }
  func.func @transform_5(%arg0: i32) -> (i32, i32) {
    %c0_i32 = arith.constant 0 : i32
    %c0_i32_0 = arith.constant 0 : i32
    %c0_i32_1 = arith.constant 0 : i32
    return %c0_i32, %c0_i32_0 : i32, i32
  }
  func.func @transform_6(%arg0: i32) -> (i32, i32, i32) {
    %c0_i32 = arith.constant 0 : i32
    %c0_i32_0 = arith.constant 0 : i32
    %c0_i32_1 = arith.constant 0 : i32
    %c0_i32_2 = arith.constant 0 : i32
    return %c0_i32, %c0_i32_0, %c0_i32_1 : i32, i32, i32
  }
  func.func @transform_7(%arg0: i32) -> (i32, i32) {
    %c0_i32 = arith.constant 0 : i32
    %c0_i32_0 = arith.constant 0 : i32
    %c0_i32_1 = arith.constant 0 : i32
    return %c0_i32, %c0_i32_0 : i32, i32
  }
  func.func @transform_8(%arg0: i32) -> (i32, i32, i32) {
    %c0_i32 = arith.constant 0 : i32
    %c0_i32_0 = arith.constant 0 : i32
    %c0_i32_1 = arith.constant 0 : i32
    return %arg0, %c0_i32, %c0_i32_0 : i32, i32, i32
  }
}

</mosaic_0001>

<bundles_post_ra>
// kernel: tile.27
= control target key start
LH: loop header
LB: loop body
LE: loop exit
PB: predicated region body
PF: predicated region fallthrough
CT: control target
= control target key end

     0   :  { %s28_s0 = inlined_call_operand.vmem [shape: f32[8], index: 0, kind: input, shape index: {}]   ;;  %s29_s1 = inlined_call_operand.vmem [shape: f32[16,8], index: 1, kind: output, shape index: {}]  }
   0x1   :  { %v4_v0 = vld [vmem:[%s28_s0] ss:$0 sm:$0xff] }
   0x2   :  { %5 = vst [vmem:[%s29_s1] sm:$0xff] %v4_v0  ;;  %8 = vst [vmem:[%s29_s1 + $0x8] sm:$0xff] %v4_v0 }

// kernel: mul.101
= control target key start
LH: loop header
LB: loop body
LE: loop exit
PB: predicated region body
PF: predicated region fallthrough
CT: control target
= control target key end

     0   :  { %s131_s10 = smov 120   ;;  %s132_s11 = smov 104   ;;  %vm3_vm0 = vcmask 64512   ;;  %vm9_vm1 = vcmask 1048512   ;;  %vm15_vm2 = vcmask 982912   ;;  %vm21_vm3 = vcmask 917312   ;;  %s207_s0 = inlined_call_operand.vmem [shape: f32[16,8], index: 0, kind: input, shape index: {}]   ;;  %s208_s1 = inlined_call_operand.vmem [shape: f32[128], index: 1, kind: output, shape index: {}]  }
   0x1   :  { %v101_v0 = vld [vmem:[%s207_s0 + $0xf] sm:$0x1]   ;;  %v103_v1 = vld [vmem:[%s207_s0 + $0xd] sm:$0x1]   ;;  %v102_v2 = vld [vmem:[%s207_s0 + $0xe] sm:$0x1]  }
   0x2   :  { %7 = vrot.lane.b32.xlu0 %v101_v0, %s131_s10  ;;  %19 = vrot.lane.b32.xlu1 %v103_v1, %s132_s11  ;;  %v104_v3 = vld [vmem:[%s207_s0 + $0xc] sm:$0x1]   ;;  %s133_s16 = smov 112   ;;  %s134_s17 = smov 96   ;;  %v105_v4 = vld [vmem:[%s207_s0 + $0xb] sm:$0x1]  }
   0x3   :  { %v106_v5 = vld [vmem:[%s207_s0 + $0xa] sm:$0x1]   ;;  %v2_v6 = vld [vmem:[%s207_s0] sm:$0x1]   ;;  %s135_s24 = smov 88   ;;  %s136_s25 = smov 80  }
   0x4   :  { %4 = vst.msk [vmem:[#allocation0] sm:$0x1] %vm3_vm0, %v2_v6   ;;  %v107_v7 = vld [vmem:[%s207_s0 + $0x9] sm:$0x1]   ;;  %v108_v8 = vld [vmem:[%s207_s0 + $0x8] sm:$0x1]  }
   0x5   :  { %s137_s30 = smov 72   ;;  %s138_s2 = smov 64   ;;  %v109_v9 = vld [vmem:[%s207_s0 + $0x7] sm:$0x1]   ;;  %v110_v10 = vld [vmem:[%s207_s0 + $0x6] sm:$0x1]  }
   0x6   :  { %13 = vrot.lane.b32.xlu0 %v102_v2, %s133_s16  ;;  %25 = vrot.lane.b32.xlu1 %v104_v3, %s134_s17  ;;  %s139_s7 = smov 56   ;;  %s140_s8 = smov 48   ;;  %v111_v11 = vld [vmem:[%s207_s0 + $0x5] sm:$0x1]   ;;  %v112_v12 = vld [vmem:[%s207_s0 + $0x4] sm:$0x1]  }
   0x7   :  { %s141_s13 = smov 40   ;;  %s142_s14 = smov 32   ;;  %v113_v13 = vld [vmem:[%s207_s0 + $0x3] sm:$0x1]   ;;  %v114_v14 = vld [vmem:[%s207_s0 + $0x2] sm:$0x1]  }
   0x8   :  { %s143_s19 = smov 24   ;;  %s144_s20 = smov 16   ;;  %v115_v15 = vld [vmem:[%s207_s0 + $0x1] sm:$0x1]   ;;  %vm27_vm4 = vcmask 851712   ;;  %vm33_vm5 = vcmask 786112  }
   0x9   :  { %s145_s0 = smov 8   ;;  %vm39_vm6 = vcmask 720512   ;;  %vm45_vm7 = vcmask 654912   ;;  %vm51_vm8 = vcmask 589312   ;;  %vm57_vm9 = vcmask 523712  }
   0xa   :  { %31 = vrot.lane.b32.xlu0 %v105_v4, %s135_s24  ;;  %37 = vrot.lane.b32.xlu1 %v106_v5, %s136_s25  ;;  %vm63_vm10 = vcmask 458112   ;;  %vm69_vm11 = vcmask 392512   ;;  %vm75_vm12 = vcmask 326912   ;;  %vm81_vm13 = vcmask 261312  }
   0xb   :  { %vm87_vm14 = vcmask 195712   ;;  %vm93_vm15 = vcmask 130112  }
   0xe   :  { %43 = vrot.lane.b32.xlu0 %v107_v7, %s137_s30  ;;  %49 = vrot.lane.b32.xlu1 %v108_v8, %s138_s2 }
  0x12   :  { %55 = vrot.lane.b32.xlu0 %v109_v9, %s139_s7  ;;  %61 = vrot.lane.b32.xlu1 %v110_v10, %s140_s8 }
  0x16   :  { %67 = vrot.lane.b32.xlu0 %v111_v11, %s141_s13  ;;  %73 = vrot.lane.b32.xlu1 %v112_v12, %s142_s14 }
  0x1a   :  { %79 = vrot.lane.b32.xlu0 %v113_v13, %s143_s19  ;;  %85 = vrot.lane.b32.xlu1 %v114_v14, %s144_s20 }
  0x1e   :  { %91 = vrot.lane.b32.xlu0 %v115_v15, %s145_s0 }
  0x74   :  { %v8_v16 = vpop.permute.xlu0 %7   ;;  %v20_v17 = vpop.permute.xlu1 %19  }
  0x75   :  { %10 = vst.msk [vmem:[#allocation0] sm:$0x1] %vm9_vm1, %v8_v16  }
  0x78   :  { %v14_v18 = vpop.permute.xlu0 %13   ;;  %v26_v19 = vpop.permute.xlu1 %25  }
  0x79   :  { %16 = vst.msk [vmem:[#allocation0] sm:$0x1] %vm15_vm2, %v14_v18  }
  0x7a   :  { %22 = vst.msk [vmem:[#allocation0] sm:$0x1] %vm21_vm3, %v20_v17  }
  0x7b   :  { %28 = vst.msk [vmem:[#allocation0] sm:$0x1] %vm27_vm4, %v26_v19  }
  0x7c   :  { %v32_v20 = vpop.permute.xlu0 %31   ;;  %v38_v21 = vpop.permute.xlu1 %37  }
  0x7d   :  { %34 = vst.msk [vmem:[#allocation0] sm:$0x1] %vm33_vm5, %v32_v20  }
  0x7e   :  { %40 = vst.msk [vmem:[#allocation0] sm:$0x1] %vm39_vm6, %v38_v21  }
  0x80   :  { %v44_v22 = vpop.permute.xlu0 %43   ;;  %v50_v23 = vpop.permute.xlu1 %49  }
  0x81   :  { %46 = vst.msk [vmem:[#allocation0] sm:$0x1] %vm45_vm7, %v44_v22  }
  0x82   :  { %52 = vst.msk [vmem:[#allocation0] sm:$0x1] %vm51_vm8, %v50_v23  }
  0x84   :  { %v56_v24 = vpop.permute.xlu0 %55   ;;  %v62_v25 = vpop.permute.xlu1 %61  }
  0x85   :  { %58 = vst.msk [vmem:[#allocation0] sm:$0x1] %vm57_vm9, %v56_v24  }
  0x86   :  { %64 = vst.msk [vmem:[#allocation0] sm:$0x1] %vm63_vm10, %v62_v25  }
  0x88   :  { %v68_v26 = vpop.permute.xlu0 %67   ;;  %v74_v27 = vpop.permute.xlu1 %73  }
  0x89   :  { %70 = vst.msk [vmem:[#allocation0] sm:$0x1] %vm69_vm11, %v68_v26  }
  0x8a   :  { %76 = vst.msk [vmem:[#allocation0] sm:$0x1] %vm75_vm12, %v74_v27  }
  0x8c   :  { %v80_v28 = vpop.permute.xlu0 %79   ;;  %v86_v29 = vpop.permute.xlu1 %85  }
  0x8d   :  { %82 = vst.msk [vmem:[#allocation0] sm:$0x1] %vm81_vm13, %v80_v28  }
  0x8e   :  { %88 = vst.msk [vmem:[#allocation0] sm:$0x1] %vm87_vm14, %v86_v29  }
  0x90   :  { %v92_v30 = vpop.permute.xlu0 %91  }
  0x91   :  { %94 = vst.msk [vmem:[#allocation0] sm:$0x1] %vm93_vm15, %v92_v30  }
  0x98   :  { %v98_v31 = vld [vmem:[#allocation0] sm:$0x1] }
  0x99   :  { %100 = vst [vmem:[%s208_s1] sm:$0x1] %v98_v31 }

// kernel: tile.34
= control target key start
LH: loop header
LB: loop body
LE: loop exit
PB: predicated region body
PF: predicated region fallthrough
CT: control target
= control target key end

     0   :  { %s131_s10 = smov 120   ;;  %s132_s11 = smov 104   ;;  %vm3_vm0 = vcmask 64512   ;;  %vm9_vm1 = vcmask 1048512   ;;  %vm15_vm2 = vcmask 982912   ;;  %vm21_vm3 = vcmask 917312   ;;  %s207_s0 = inlined_call_operand.vmem [shape: f32[16,8], index: 0, kind: input, shape index: {}]   ;;  %s208_s1 = inlined_call_operand.vmem [shape: f32[1,128], index: 1, kind: output, shape index: {}]  }
   0x1   :  { %v101_v0 = vld [vmem:[%s207_s0 + $0xf] sm:$0x1]   ;;  %v103_v1 = vld [vmem:[%s207_s0 + $0xd] sm:$0x1]   ;;  %v102_v2 = vld [vmem:[%s207_s0 + $0xe] sm:$0x1]  }
   0x2   :  { %7 = vrot.lane.b32.xlu0 %v101_v0, %s131_s10  ;;  %19 = vrot.lane.b32.xlu1 %v103_v1, %s132_s11  ;;  %v104_v3 = vld [vmem:[%s207_s0 + $0xc] sm:$0x1]   ;;  %s133_s16 = smov 112   ;;  %s134_s17 = smov 96   ;;  %v105_v4 = vld [vmem:[%s207_s0 + $0xb] sm:$0x1]  }
   0x3   :  { %v106_v5 = vld [vmem:[%s207_s0 + $0xa] sm:$0x1]   ;;  %v2_v6 = vld [vmem:[%s207_s0] sm:$0x1]   ;;  %s135_s24 = smov 88   ;;  %s136_s25 = smov 80  }
   0x4   :  { %4 = vst.msk [vmem:[#allocation0] sm:$0x1] %vm3_vm0, %v2_v6   ;;  %v107_v7 = vld [vmem:[%s207_s0 + $0x9] sm:$0x1]   ;;  %v108_v8 = vld [vmem:[%s207_s0 + $0x8] sm:$0x1]  }
   0x5   :  { %s137_s30 = smov 72   ;;  %s138_s2 = smov 64   ;;  %v109_v9 = vld [vmem:[%s207_s0 + $0x7] sm:$0x1]   ;;  %v110_v10 = vld [vmem:[%s207_s0 + $0x6] sm:$0x1]  }
   0x6   :  { %13 = vrot.lane.b32.xlu0 %v102_v2, %s133_s16  ;;  %25 = vrot.lane.b32.xlu1 %v104_v3, %s134_s17  ;;  %s139_s7 = smov 56   ;;  %s140_s8 = smov 48   ;;  %v111_v11 = vld [vmem:[%s207_s0 + $0x5] sm:$0x1]   ;;  %v112_v12 = vld [vmem:[%s207_s0 + $0x4] sm:$0x1]  }
   0x7   :  { %s141_s13 = smov 40   ;;  %s142_s14 = smov 32   ;;  %v113_v13 = vld [vmem:[%s207_s0 + $0x3] sm:$0x1]   ;;  %v114_v14 = vld [vmem:[%s207_s0 + $0x2] sm:$0x1]  }
   0x8   :  { %s143_s19 = smov 24   ;;  %s144_s20 = smov 16   ;;  %v115_v15 = vld [vmem:[%s207_s0 + $0x1] sm:$0x1]   ;;  %vm27_vm4 = vcmask 851712   ;;  %vm33_vm5 = vcmask 786112  }
   0x9   :  { %s145_s0 = smov 8   ;;  %vm39_vm6 = vcmask 720512   ;;  %vm45_vm7 = vcmask 654912   ;;  %vm51_vm8 = vcmask 589312   ;;  %vm57_vm9 = vcmask 523712  }
   0xa   :  { %31 = vrot.lane.b32.xlu0 %v105_v4, %s135_s24  ;;  %37 = vrot.lane.b32.xlu1 %v106_v5, %s136_s25  ;;  %vm63_vm10 = vcmask 458112   ;;  %vm69_vm11 = vcmask 392512   ;;  %vm75_vm12 = vcmask 326912   ;;  %vm81_vm13 = vcmask 261312  }
   0xb   :  { %vm87_vm14 = vcmask 195712   ;;  %vm93_vm15 = vcmask 130112  }
   0xe   :  { %43 = vrot.lane.b32.xlu0 %v107_v7, %s137_s30  ;;  %49 = vrot.lane.b32.xlu1 %v108_v8, %s138_s2 }
  0x12   :  { %55 = vrot.lane.b32.xlu0 %v109_v9, %s139_s7  ;;  %61 = vrot.lane.b32.xlu1 %v110_v10, %s140_s8 }
  0x16   :  { %67 = vrot.lane.b32.xlu0 %v111_v11, %s141_s13  ;;  %73 = vrot.lane.b32.xlu1 %v112_v12, %s142_s14 }
  0x1a   :  { %79 = vrot.lane.b32.xlu0 %v113_v13, %s143_s19  ;;  %85 = vrot.lane.b32.xlu1 %v114_v14, %s144_s20 }
  0x1e   :  { %91 = vrot.lane.b32.xlu0 %v115_v15, %s145_s0 }
  0x74   :  { %v8_v16 = vpop.permute.xlu0 %7   ;;  %v20_v17 = vpop.permute.xlu1 %19  }
  0x75   :  { %10 = vst.msk [vmem:[#allocation0] sm:$0x1] %vm9_vm1, %v8_v16  }
  0x78   :  { %v14_v18 = vpop.permute.xlu0 %13   ;;  %v26_v19 = vpop.permute.xlu1 %25  }
  0x79   :  { %16 = vst.msk [vmem:[#allocation0] sm:$0x1] %vm15_vm2, %v14_v18  }
  0x7a   :  { %22 = vst.msk [vmem:[#allocation0] sm:$0x1] %vm21_vm3, %v20_v17  }
  0x7b   :  { %28 = vst.msk [vmem:[#allocation0] sm:$0x1] %vm27_vm4, %v26_v19  }
  0x7c   :  { %v32_v20 = vpop.permute.xlu0 %31   ;;  %v38_v21 = vpop.permute.xlu1 %37  }
  0x7d   :  { %34 = vst.msk [vmem:[#allocation0] sm:$0x1] %vm33_vm5, %v32_v20  }
  0x7e   :  { %40 = vst.msk [vmem:[#allocation0] sm:$0x1] %vm39_vm6, %v38_v21  }
  0x80   :  { %v44_v22 = vpop.permute.xlu0 %43   ;;  %v50_v23 = vpop.permute.xlu1 %49  }
  0x81   :  { %46 = vst.msk [vmem:[#allocation0] sm:$0x1] %vm45_vm7, %v44_v22  }
  0x82   :  { %52 = vst.msk [vmem:[#allocation0] sm:$0x1] %vm51_vm8, %v50_v23  }
  0x84   :  { %v56_v24 = vpop.permute.xlu0 %55   ;;  %v62_v25 = vpop.permute.xlu1 %61  }
  0x85   :  { %58 = vst.msk [vmem:[#allocation0] sm:$0x1] %vm57_vm9, %v56_v24  }
  0x86   :  { %64 = vst.msk [vmem:[#allocation0] sm:$0x1] %vm63_vm10, %v62_v25  }
  0x88   :  { %v68_v26 = vpop.permute.xlu0 %67   ;;  %v74_v27 = vpop.permute.xlu1 %73  }
  0x89   :  { %70 = vst.msk [vmem:[#allocation0] sm:$0x1] %vm69_vm11, %v68_v26  }
  0x8a   :  { %76 = vst.msk [vmem:[#allocation0] sm:$0x1] %vm75_vm12, %v74_v27  }
  0x8c   :  { %v80_v28 = vpop.permute.xlu0 %79   ;;  %v86_v29 = vpop.permute.xlu1 %85  }
  0x8d   :  { %82 = vst.msk [vmem:[#allocation0] sm:$0x1] %vm81_vm13, %v80_v28  }
  0x8e   :  { %88 = vst.msk [vmem:[#allocation0] sm:$0x1] %vm87_vm14, %v86_v29  }
  0x90   :  { %v92_v30 = vpop.permute.xlu0 %91  }
  0x91   :  { %94 = vst.msk [vmem:[#allocation0] sm:$0x1] %vm93_vm15, %v92_v30  }
  0x98   :  { %v98_v31 = vld [vmem:[#allocation0] sm:$0x1] }
  0x99   :  { %100 = vst [vmem:[%s208_s1] sm:$0x1] %v98_v31 }

// kernel: decoder_block_forward.1
= control target key start
LH: loop header
LB: loop body
LE: loop exit
PB: predicated region body
PF: predicated region fallthrough
CT: control target
= control target key end

     0   :  { %vm52_vm0 = vcmask 130048   ;;  %s1430_s17 = smov 64   ;;  %vm126_vm1 = vcmask 261120   ;;  %vm202_vm2 = vcmask 523264   ;;  %vm225_vm3 = vcmask 1040384   ;;  %s1687_s0 = inlined_call_operand.vmem [shape: bf16[2,8,32], index: 0, kind: input, shape index: {}]   ;;  %s1688_s2 = inlined_call_operand.vmem [shape: bf16[32,16], index: 2, kind: input, shape index: {}]   ;;  %s1689_s3 = inlined_call_operand.vmem [shape: bf16[32,64], index: 3, kind: input, shape index: {}]   ;;  %s1690_s1 = inlined_call_operand.vmem [shape: bf16[2,16,64], index: 1, kind: input, shape index: {}]   ;;  %s1691_s4 = inlined_call_operand.vmem [shape: bf16[3,128,128], index: 4, kind: input, shape index: {}]   ;;  %s1692_s6 = inlined_call_operand.vmem [shape: bf16[3,128,128], index: 6, kind: input, shape index: {}]   ;;  %s1693_s5 = inlined_call_operand.vmem [shape: f32[1,128], index: 5, kind: input, shape index: {}]   ;;  %s1694_s7 = inlined_call_operand.vmem [shape: f32[1,128], index: 7, kind: input, shape index: {}]   ;;  %s1695_s8 = inlined_call_operand.vmem [shape: bf16[2,16,128], index: 8, kind: output, shape index: {}]  }
   0x1   :  { %v1375_v0 = vld [vmem:[%s1687_s0] sm:$0xff]   ;;  %v1377_v2 = vld [vmem:[%s1688_s2 + $0x8] sm:$0xff]   ;;  %v1384_v9 = vld [vmem:[%s1691_s4 + $0x50] sm:$0xff]   ;;  %vm226_vm4 = vsmask.f32 256  ;;  %vm236_vm6 = vcmask 1047552  }
   0x2   :  { %v1376_v1 = vld [vmem:[%s1688_s2] sm:$0xff]   ;;  %1224 = vmatprep.subr.bf16.mxu0 %v1375_v0  ;;  %v1379_v4 = vld [vmem:[%s1689_s3 + $0x8] sm:$0xff]   ;;  %v1385_v10 = vld [vmem:[%s1691_s4 + $0x58] sm:$0xff]   ;;  %vm237_vm7 = vsmask.f32 7424 }
   0x3   :  { %1225 = vmatpush3.bf16.msra.mxu0 %v1375_v0  ;;  %1226 = vmatprep.mubr.msk.bf16.mxu0 %vm52_vm0, %v1376_v1  ;;  %v1378_v3 = vld [vmem:[%s1689_s3] sm:$0xff]   ;;  %v1381_v6 = vld [vmem:[%s1690_s1 + $0x8] sm:$0xff]   ;;  %v1388_v13 = vld [vmem:[%s1691_s4 + $0x70] sm:$0xff]  }
   0x4   :  { %1230 = vmatprep.subr.bf16.mxu1 %v1378_v3  ;;  %v1380_v5 = vld [vmem:[%s1690_s1] sm:$0xff]   ;;  %v1383_v8 = vld [vmem:[%s1691_s4 + $0x48] sm:$0xff]   ;;  %v1389_v20 = vld [vmem:[%s1691_s4 + $0x78] sm:$0xff]  }
   0x5   :  { %1231 = vmatpush3.bf16.msra.mxu1 %v1378_v3  ;;  %198 = vrot.lane.b32.xlu0 %v1380_v5, %s1430_s17  ;;  %v1382_v7 = vld [vmem:[%s1691_s4 + $0x40] sm:$0xff]   ;;  %v1387_v12 = vld [vmem:[%s1691_s4 + $0x68] sm:$0xff]   ;;  %v1408_v24 = vld [vmem:[%s1692_s6 + $0x50] sm:$0xff]  }
   0x6   :  { %1227 = vmatmul.mubr.msk.bf16.vlgmr.msra.gmra.mrb[0].mxu0 %vm52_vm0, %v1377_v2  ;;  %1232 = vmatprep.subr.bf16.mxu1 %v1379_v4  ;;  %v1386_v11 = vld [vmem:[%s1691_s4 + $0x60] sm:$0xff]   ;;  %v1407_v23 = vld [vmem:[%s1692_s6 + $0x48] sm:$0xff]   ;;  %v1409_v25 = vld [vmem:[%s1692_s6 + $0x58] sm:$0xff]  }
   0x7   :  { %1238 = vmatprep.subr.bf16.mxu0 %v1382_v7  ;;  %v1390_v21 = vld [vmem:[%s1691_s4] sm:$0xff]   ;;  %v1411_v27 = vld [vmem:[%s1692_s6 + $0x68] sm:$0xff]   ;;  %vm1548_vm5 = vmand %vm225_vm3, %vm226_vm4 }
   0x8   :  { %1239 = vmatpush3.bf16.msra.mxu0 %v1382_v7  ;;  %v1406_v22 = vld [vmem:[%s1692_s6 + $0x40] sm:$0xff]   ;;  %v1391_v37 = vld [vmem:[%s1691_s4 + $0x8] sm:$0xff]   ;;  %v1392_v43 = vld [vmem:[%s1691_s4 + $0x10] sm:$0xff]  }
   0x9   :  { %1233 = vmatpush3.bf16.msra.mxu1 %v1379_v4  ;;  %200 = vrot.lane.b32.xlu0 %v1381_v6, %s1430_s17  ;;  %v1410_v26 = vld [vmem:[%s1692_s6 + $0x60] sm:$0xff]   ;;  %v1393_v46 = vld [vmem:[%s1691_s4 + $0x18] sm:$0xff]   ;;  %v1395_v48 = vld [vmem:[%s1691_s4 + $0x28] sm:$0xff]  }
   0xa   :  { %1240 = vmatprep.subr.bf16.mxu0 %v1383_v8  ;;  %1298 = vmatprep.subr.bf16.mxu1 %v1406_v22  ;;  %v1394_v47 = vld [vmem:[%s1691_s4 + $0x20] sm:$0xff]   ;;  %v1396_v49 = vld [vmem:[%s1691_s4 + $0x30] sm:$0xff]   ;;  %v1397_v51 = vld [vmem:[%s1691_s4 + $0x38] sm:$0xff]  }
   0xb   :  { %v1398_v55 = vld [vmem:[%s1691_s4 + $0x80] sm:$0xff]   ;;  %vm1577_vm8 = vmand %vm236_vm6, %vm237_vm7  ;;  %v1399_v59 = vld [vmem:[%s1691_s4 + $0x88] sm:$0xff]  }
   0xc   :  { %1241 = vmatpush3.bf16.msra.mxu0 %v1383_v8  ;;  %v1400_v62 = vld [vmem:[%s1691_s4 + $0x90] sm:$0xff]   ;;  %v1401_v63 = vld [vmem:[%s1691_s4 + $0x98] sm:$0xff]   ;;  %v1402_v0 = vld [vmem:[%s1691_s4 + $0xa0] sm:$0xff]  }
   0xd   :  { %1242 = vmatprep.subr.bf16.mxu0 %v1384_v9  ;;  %v1403_v1 = vld [vmem:[%s1691_s4 + $0xa8] sm:$0xff]   ;;  %v1404_v2 = vld [vmem:[%s1691_s4 + $0xb0] sm:$0xff]   ;;  %v1405_v3 = vld [vmem:[%s1691_s4 + $0xb8] sm:$0xff]  }
   0xe   :  { %v1412_v7 = vld [vmem:[%s1692_s6 + $0x70] sm:$0xff]   ;;  %v1413_v8 = vld [vmem:[%s1692_s6 + $0x78] sm:$0xff]   ;;  %v1426_v42 = vld [vmem:[%s1692_s6 + $0xa0] sm:$0xff]  }
  0x10   :  { %1243 = vmatpush3.bf16.msra.mxu0 %v1384_v9  ;;  %v1414_v9 = vld [vmem:[%s1692_s6] sm:$0xff]  }
  0x11   :  { %1244 = vmatprep.subr.bf16.mxu0 %v1385_v10 }
  0x14   :  { %1245 = vmatpush3.bf16.msra.mxu0 %v1385_v10  ;;  %v1080_v10 = vld [vmem:[%s1693_s5] ss:$0 sm:$0xff] }
  0x15   :  { %1246 = vmatprep.subr.bf16.mxu0 %v1386_v11 }
  0x18   :  { %1247 = vmatpush3.bf16.msra.mxu0 %v1386_v11 }
  0x19   :  { %1248 = vmatprep.subr.bf16.mxu0 %v1387_v12 }
  0x1c   :  { %1249 = vmatpush3.bf16.msra.mxu0 %v1387_v12 }
  0x1d   :  { %1250 = vmatprep.subr.bf16.mxu0 %v1388_v13 }
  0x20   :  { %1251 = vmatpush3.bf16.msra.mxu0 %v1388_v13 }
  0x21   :  { %1252 = vmatprep.subr.bf16.mxu0 %v1389_v20 }
  0x24   :  { %1253 = vmatpush3.bf16.msra.mxu0 %v1389_v20 }
  0x25   :  { %1258 = vmatprep.subr.bf16.mxu0 %v1390_v21 }
  0x77   :  { %v199_v28 = vpop.permute.xlu0 %198 }
  0x7b   :  { %v201_v35 = vpop.permute.xlu0 %200 }
  0xd9   :  { %v1228_v14 = vpop.f32.mrb[0].mxu0 }
  0xda   :  { %v93_v15 = vpop.f32.mrb[1].mxu0 }
  0xdb   :  { %v1229_v16 = vpop.f32.mrb[2].mxu0 }
  0xdc   :  { %v109_v17 = vpack.c.bf16 %v1229_v16, %v1228_v14  ;;  %v96_v18 = vpop.f32.mrb[3].mxu0 }
  0xdd   :  { %v108_v19 = vpack.c.bf16 %v96_v18, %v93_v15 }
  0xdf   :  { %1234 = vmatprep.mubr.msk.bf16.mxu1 %vm126_vm1, %v108_v19 }
  0xe0   :  { %1235 = vmatmul.mubr.msk.bf16.vlgmr.msra.gmra.mrb[0].mxu1 %vm126_vm1, %v109_v17 }
  0xe1   :  { %1299 = vmatpush3.bf16.msra.mxu1 %v1406_v22 }
  0xe2   :  { %1300 = vmatprep.subr.bf16.mxu1 %v1407_v23 }
  0xe5   :  { %1301 = vmatpush3.bf16.msra.mxu1 %v1407_v23 }
  0xe6   :  { %1302 = vmatprep.subr.bf16.mxu1 %v1408_v24 }
  0xe9   :  { %1303 = vmatpush3.bf16.msra.mxu1 %v1408_v24 }
  0xea   :  { %1304 = vmatprep.subr.bf16.mxu1 %v1409_v25 }
  0xed   :  { %1305 = vmatpush3.bf16.msra.mxu1 %v1409_v25  ;;  %v1415_v25 = vld [vmem:[%s1692_s6 + $0x8] sm:$0xff]  }
  0xee   :  { %1306 = vmatprep.subr.bf16.mxu1 %v1410_v26 }
  0xf1   :  { %1307 = vmatpush3.bf16.msra.mxu1 %v1410_v26 }
  0xf2   :  { %1308 = vmatprep.subr.bf16.mxu1 %v1411_v27 }
  0xf5   :  { %1309 = vmatpush3.bf16.msra.mxu1 %v1411_v27 }
  0xf6   :  { %1310 = vmatprep.subr.bf16.mxu1 %v1412_v7 }
  0xf9   :  { %1311 = vmatpush3.bf16.msra.mxu1 %v1412_v7 }
  0xfa   :  { %1312 = vmatprep.subr.bf16.mxu1 %v1413_v8 }
  0xfd   :  { %1313 = vmatpush3.bf16.msra.mxu1 %v1413_v8 }
  0xfe   :  { %1318 = vmatprep.subr.bf16.mxu1 %v1414_v9 }
 0x1b3   :  { %v1236_v29 = vpop.f32.mrb[0].mxu1 }
 0x1b4   :  { %v167_v30 = vpop.f32.mrb[1].mxu1 }
 0x1b5   :  { %v1237_v31 = vpop.f32.mrb[2].mxu1 }
 0x1b6   :  { %v183_v32 = vpack.c.bf16 %v1237_v31, %v1236_v29  ;;  %v170_v33 = vpop.f32.mrb[3].mxu1  ;;  %v1416_v29 = vld [vmem:[%s1692_s6 + $0x10] sm:$0xff]  }
 0x1b7   :  { %v182_v34 = vpack.c.bf16 %v170_v33, %v167_v30  ;;  %v1418_v33 = vld [vmem:[%s1692_s6 + $0x20] sm:$0xff]  }
 0x1b8   :  { %v1545_v38 = vsel %vm202_vm2, %v183_v32, %v201_v35  ;;  %v1417_v32 = vld [vmem:[%s1692_s6 + $0x18] sm:$0xff]   ;;  %v1420_v35 = vld [vmem:[%s1692_s6 + $0x30] sm:$0xff]  }
 0x1b9   :  { %v205_v36 = vsel %vm202_vm2, %v182_v34, %v199_v28  ;;  %v217_v50 = vshrl.u32 %v1545_v38, 16  ;;  %v220_v54 = vshll.u32 %v1545_v38, 16  ;;  %v1419_v34 = vld [vmem:[%s1692_s6 + $0x28] sm:$0xff]  }
 0x1ba   :  { %v211_v39 = vshrl.u32 %v205_v36, 16  ;;  %1254 = vmatprep.mubr.bf16.mxu0 %v205_v36  ;;  %v214_v40 = vshll.u32 %v205_v36, 16 }
 0x1bb   :  { %1255 = vmatmul.mubr.bf16.vlgmr.msra.gmra.mrb[4].mxu0 %v1545_v38  ;;  %v219_v52 = vrot.slane %v217_v50, 7  ;;  %v232_v4 = vrot.slane %v220_v54, 1 }
 0x1bc   :  { %1259 = vmatpush3.bf16.msra.mxu0 %v1390_v21  ;;  %v213_v41 = vrot.slane %v211_v39, 7  ;;  %v230_v53 = vrot.slane %v214_v40, 1 }
 0x1bd   :  { %1260 = vmatprep.subr.bf16.mxu0 %v1391_v37  ;;  %v222_v56 = vor.u32 %v220_v54, %v219_v52  ;;  %v233_v5 = vor.u32 %v232_v4, %v217_v50  ;;  %v1427_v50 = vld [vmem:[%s1692_s6 + $0xa8] sm:$0xff]   ;;  %v1429_v52 = vld [vmem:[%s1692_s6 + $0xb8] sm:$0xff]  }
 0x1be   :  { %v216_v44 = vor.u32 %v214_v40, %v213_v41  ;;  %v231_v57 = vor.u32 %v230_v53, %v211_v39  ;;  %v1422_v41 = vld [vmem:[%s1692_s6 + $0x80] sm:$0xff]  }
 0x1bf   :  { %v229_v60 = vsel %vm1548_vm5, 0, %v222_v56  ;;  %v240_v6 = vsel %vm1577_vm8, %v233_v5, 0  ;;  %v1137_v56 = vld [vmem:[%s1694_s7] ss:$0 sm:$0xff] }
 0x1c0   :  { %1261 = vmatpush3.bf16.msra.mxu0 %v1391_v37  ;;  %v228_v45 = vsel %vm1548_vm5, 0, %v216_v44  ;;  %v239_v61 = vsel %vm1577_vm8, %v231_v57, 0  ;;  %v1421_v37 = vld [vmem:[%s1692_s6 + $0x38] sm:$0xff]  }
 0x1c1   :  { %1274 = vmatprep.mubr.bf16.mxu0 %v228_v45  ;;  %1262 = vmatprep.subr.bf16.mxu0 %v1392_v43  ;;  %v1423_v45 = vld [vmem:[%s1692_s6 + $0x88] sm:$0xff]  }
 0x1c4   :  { %1263 = vmatpush3.bf16.msra.mxu0 %v1392_v43 }
 0x1c5   :  { %1264 = vmatprep.subr.bf16.mxu0 %v1393_v46 }
 0x1c8   :  { %1265 = vmatpush3.bf16.msra.mxu0 %v1393_v46 }
 0x1c9   :  { %1266 = vmatprep.subr.bf16.mxu0 %v1394_v47 }
 0x1cc   :  { %1267 = vmatpush3.bf16.msra.mxu0 %v1394_v47 }
 0x1cd   :  { %1268 = vmatprep.subr.bf16.mxu0 %v1395_v48 }
 0x1d0   :  { %1269 = vmatpush3.bf16.msra.mxu0 %v1395_v48  ;;  %v1424_v48 = vld [vmem:[%s1692_s6 + $0x90] sm:$0xff]  }
 0x1d1   :  { %1270 = vmatprep.subr.bf16.mxu0 %v1396_v49 }
 0x1d4   :  { %1271 = vmatpush3.bf16.msra.mxu0 %v1396_v49  ;;  %v1425_v49 = vld [vmem:[%s1692_s6 + $0x98] sm:$0xff]  }
 0x1d5   :  { %1272 = vmatprep.subr.bf16.mxu0 %v1397_v51 }
 0x1d8   :  { %1273 = vmatpush3.bf16.msra.mxu0 %v1397_v51  ;;  %v1428_v51 = vld [vmem:[%s1692_s6 + $0xb0] sm:$0xff]  }
 0x1d9   :  { %1278 = vmatprep.subr.bf16.mxu0 %v1398_v55 }
 0x1db   :  { %1275 = vmatmul.mubr.bf16.vlgmr.msra.gmra.mrb[4].mxu0 %v229_v60 }
 0x1dc   :  { %1279 = vmatpush3.bf16.msra.mxu0 %v1398_v55  ;;  %1294 = vmatprep.mubr.bf16.mxu0 %v239_v61 }
 0x1dd   :  { %1280 = vmatprep.subr.bf16.mxu0 %v1399_v59 }
 0x1e0   :  { %1281 = vmatpush3.bf16.msra.mxu0 %v1399_v59 }
 0x1e1   :  { %1282 = vmatprep.subr.bf16.mxu0 %v1400_v62 }
 0x1e4   :  { %1283 = vmatpush3.bf16.msra.mxu0 %v1400_v62 }
 0x1e5   :  { %1284 = vmatprep.subr.bf16.mxu0 %v1401_v63 }
 0x1e8   :  { %1285 = vmatpush3.bf16.msra.mxu0 %v1401_v63 }
 0x1e9   :  { %1286 = vmatprep.subr.bf16.mxu0 %v1402_v0 }
 0x1ec   :  { %1287 = vmatpush3.bf16.msra.mxu0 %v1402_v0 }
 0x1ed   :  { %1288 = vmatprep.subr.bf16.mxu0 %v1403_v1 }
 0x1f0   :  { %1289 = vmatpush3.bf16.msra.mxu0 %v1403_v1 }
 0x1f1   :  { %1290 = vmatprep.subr.bf16.mxu0 %v1404_v2 }
 0x1f4   :  { %1291 = vmatpush3.bf16.msra.mxu0 %v1404_v2 }
 0x1f5   :  { %1292 = vmatprep.subr.bf16.mxu0 %v1405_v3 }
 0x1f8   :  { %1293 = vmatpush3.bf16.msra.mxu0 %v1405_v3 }
 0x1fb   :  { %1295 = vmatmul.mubr.bf16.vlgmr.msra.gmra.mrb[4].mxu0 %v240_v6 }
 0x2ce   :  { %v1296_v11 = vpop.f32.mrb[4].mxu0 }
 0x2cf   :  { %v595_v12 = vadd.f32 %v1296_v11, %v1080_v10  ;;  %v567_v13 = vpop.f32.mrb[5].mxu0 }
 0x2d0   :  { %v593_v14 = vadd.f32 %v1080_v10, %v567_v13  ;;  %v1297_v15 = vpop.f32.mrb[6].mxu0 }
 0x2d1   :  { %v596_v16 = vadd.f32 %v1297_v15, %v1080_v10  ;;  %v570_v17 = vpop.f32.mrb[7].mxu0  ;;  %v599_v19 = vmax.f32 %v595_v12, 0.0 }
 0x2d2   :  { %v594_v18 = vadd.f32 %v1080_v10, %v570_v17  ;;  %v597_v21 = vmax.f32 %v593_v14, 0.0 }
 0x2d3   :  { %v600_v20 = vmax.f32 %v596_v16, 0.0 }
 0x2d4   :  { %v598_v22 = vmax.f32 %v594_v18, 0.0 }
 0x2d5   :  { %v1620_v23 = vpack.c.bf16 %v600_v20, %v599_v19 }
 0x2d6   :  { %v601_v24 = vpack.c.bf16 %v598_v22, %v597_v21 }
 0x2d7   :  { %v611_v36 = vshrl.u32 %v1620_v23, 16  ;;  %v614_v40 = vshll.u32 %v1620_v23, 16 }
 0x2d8   :  { %v604_v26 = vshrl.u32 %v601_v24, 16  ;;  %1314 = vmatprep.mubr.bf16.mxu1 %v601_v24  ;;  %v607_v28 = vshll.u32 %v601_v24, 16 }
 0x2d9   :  { %1315 = vmatmul.mubr.bf16.vlgmr.msra.gmra.mrb[4].mxu1 %v1620_v23  ;;  %v613_v38 = vrot.slane %v611_v36, 7  ;;  %v623_v53 = vrot.slane %v614_v40, 1 }
 0x2da   :  { %1319 = vmatpush3.bf16.msra.mxu1 %v1414_v9  ;;  %v606_v27 = vrot.slane %v604_v26, 7  ;;  %v621_v39 = vrot.slane %v607_v28, 1 }
 0x2db   :  { %1320 = vmatprep.subr.bf16.mxu1 %v1415_v25  ;;  %v616_v43 = vor.u32 %v614_v40, %v613_v38  ;;  %v624_v54 = vor.u32 %v623_v53, %v611_v36 }
 0x2dc   :  { %v609_v30 = vor.u32 %v607_v28, %v606_v27  ;;  %v622_v44 = vor.u32 %v621_v39, %v604_v26 }
 0x2dd   :  { %v620_v46 = vsel %vm1548_vm5, 0, %v616_v43  ;;  %v628_v55 = vsel %vm1577_vm8, %v624_v54, 0 }
 0x2de   :  { %1321 = vmatpush3.bf16.msra.mxu1 %v1415_v25  ;;  %v619_v31 = vsel %vm1548_vm5, 0, %v609_v30  ;;  %v627_v47 = vsel %vm1577_vm8, %v622_v44, 0 }
 0x2df   :  { %1334 = vmatprep.mubr.bf16.mxu1 %v619_v31  ;;  %1322 = vmatprep.subr.bf16.mxu1 %v1416_v29 }
 0x2e2   :  { %1323 = vmatpush3.bf16.msra.mxu1 %v1416_v29 }
 0x2e3   :  { %1324 = vmatprep.subr.bf16.mxu1 %v1417_v32 }
 0x2e6   :  { %1325 = vmatpush3.bf16.msra.mxu1 %v1417_v32 }
 0x2e7   :  { %1326 = vmatprep.subr.bf16.mxu1 %v1418_v33 }
 0x2ea   :  { %1327 = vmatpush3.bf16.msra.mxu1 %v1418_v33 }
 0x2eb   :  { %1328 = vmatprep.subr.bf16.mxu1 %v1419_v34 }
 0x2ee   :  { %1329 = vmatpush3.bf16.msra.mxu1 %v1419_v34 }
 0x2ef   :  { %1330 = vmatprep.subr.bf16.mxu1 %v1420_v35 }
 0x2f2   :  { %1331 = vmatpush3.bf16.msra.mxu1 %v1420_v35 }
 0x2f3   :  { %1332 = vmatprep.subr.bf16.mxu1 %v1421_v37 }
 0x2f6   :  { %1333 = vmatpush3.bf16.msra.mxu1 %v1421_v37 }
 0x2f7   :  { %1338 = vmatprep.subr.bf16.mxu1 %v1422_v41 }
 0x2f9   :  { %1335 = vmatmul.mubr.bf16.vlgmr.msra.gmra.mrb[4].mxu1 %v620_v46 }
 0x2fa   :  { %1339 = vmatpush3.bf16.msra.mxu1 %v1422_v41  ;;  %1354 = vmatprep.mubr.bf16.mxu1 %v627_v47 }
 0x2fb   :  { %1340 = vmatprep.subr.bf16.mxu1 %v1423_v45 }
 0x2fe   :  { %1341 = vmatpush3.bf16.msra.mxu1 %v1423_v45 }
 0x2ff   :  { %1342 = vmatprep.subr.bf16.mxu1 %v1424_v48 }
 0x302   :  { %1343 = vmatpush3.bf16.msra.mxu1 %v1424_v48 }
 0x303   :  { %1344 = vmatprep.subr.bf16.mxu1 %v1425_v49 }
 0x306   :  { %1345 = vmatpush3.bf16.msra.mxu1 %v1425_v49 }
 0x307   :  { %1346 = vmatprep.subr.bf16.mxu1 %v1426_v42 }
 0x30a   :  { %1347 = vmatpush3.bf16.msra.mxu1 %v1426_v42 }
 0x30b   :  { %1348 = vmatprep.subr.bf16.mxu1 %v1427_v50 }
 0x30e   :  { %1349 = vmatpush3.bf16.msra.mxu1 %v1427_v50 }
 0x30f   :  { %1350 = vmatprep.subr.bf16.mxu1 %v1428_v51 }
 0x312   :  { %1351 = vmatpush3.bf16.msra.mxu1 %v1428_v51 }
 0x313   :  { %1352 = vmatprep.subr.bf16.mxu1 %v1429_v52 }
 0x316   :  { %1353 = vmatpush3.bf16.msra.mxu1 %v1429_v52 }
 0x319   :  { %1355 = vmatmul.mubr.bf16.vlgmr.msra.gmra.mrb[4].mxu1 %v628_v55 }
 0x3ec   :  { %v1356_v57 = vpop.f32.mrb[4].mxu1 }
 0x3ed   :  { %v983_v59 = vadd.f32 %v1356_v57, %v1137_v56  ;;  %v955_v60 = vpop.f32.mrb[5].mxu1 }
 0x3ee   :  { %v981_v61 = vadd.f32 %v1137_v56, %v955_v60  ;;  %v1357_v62 = vpop.f32.mrb[6].mxu1 }
 0x3ef   :  { %v984_v63 = vadd.f32 %v1357_v62, %v1137_v56  ;;  %v958_v0 = vpop.f32.mrb[7].mxu1  ;;  %v987_v2 = vmax.f32 %v983_v59, 0.0 }
 0x3f0   :  { %v982_v1 = vadd.f32 %v1137_v56, %v958_v0  ;;  %v985_v4 = vmax.f32 %v981_v61, 0.0 }
 0x3f1   :  { %v988_v3 = vmax.f32 %v984_v63, 0.0 }
 0x3f2   :  { %v986_v5 = vmax.f32 %v982_v1, 0.0 }
 0x3f3   :  { %v1154_v6 = vpack.c.bf16 %v988_v3, %v987_v2 }
 0x3f4   :  { %v1149_v58 = vpack.c.bf16 %v986_v5, %v985_v4 }
 0x3f5   :  { %1156 = vst [vmem:[%s1695_s8 + $0x8] sm:$0xff] %v1154_v6  }
 0x3f6   :  { %1150 = vst [vmem:[%s1695_s8] sm:$0xff] %v1149_v58  }

</bundles_post_ra>
